<compile_context>
chip_gen: v7x
topology: tpu7x:2x2x1
jax: 0.10.0
libtpu: 0.0.40
codegen_flags: <defaults>
</compile_context>

<pallas_src>
from typing import NamedTuple, Optional

import jax
import jax.numpy as jnp
from jax.experimental import pallas as pl
from jax.experimental.pallas import tpu as pltpu


def _round_up(x, m):
    return ((x + m - 1) // m) * m


def _vmem_capacity_bytes():
    """Physical VMEM per TensorCore; conservative 64 MiB (v7x) fallback."""
    try:
        info = pltpu.get_tpu_info()
        cap = getattr(info, "vmem_capacity_bytes", None)
        if cap:
            return int(cap)
    except Exception:
        pass
    return 64 << 20


def _plan_tiles(d1, d2, d3, cdt, out_dtype, *, block_b=None, block_k=None,
                block_n=None, w2_buffers=2):
    """Pick (block_b, block_k, block_n) that fit the chip's VMEM budget.

    Returns (block_b, block_k, block_n, d1p, vmem_limit, row_mult).
    Tile sizes the caller fixed explicitly are never shrunk.
    """
    itm = jnp.dtype(cdt).itemsize
    out_itm = jnp.dtype(out_dtype).itemsize
    row_mult = 16 if itm == 2 else 8

    cap = _vmem_capacity_bytes()
    budget = int(0.80 * cap)

    d1p = _round_up(d1, 128)

    bb = block_b if block_b is not None else (512 if cap >= (96 << 20) else 256)
    bb = _round_up(max(int(bb), row_mult), row_mult)
    bk = block_k if block_k is not None else min(512, _round_up(d2, 128))
    bk = _round_up(max(int(bk), 128), 128)
    bn = block_n if block_n is not None else min(2048, _round_up(d3, 128))
    bn = _round_up(max(int(bn), 128), 128)

    fixed_b = block_b is not None
    fixed_k = block_k is not None
    fixed_n = block_n is not None

    def need(bb_, bk_, bn_):
        return (2 * (bb_ * d1p + d1p * bk_) * itm        # x, w1 (double buf)
                + 2 * (bk_ + bn_) * 4                    # b1, b2 tiles
                + w2_buffers * bk_ * bn_ * itm           # w2 tiles
                + 2 * bb_ * bn_ * out_itm                # out tiles
                + bb_ * bn_ * 4                          # f32 accumulator
                + bb_ * bk_ * (4 + itm)                  # hidden temp + cast
                + (1 << 20))                             # Mosaic scratch slack

    def half_128(v):
        return max(128, (v // 2) // 128 * 128)

    def half_row(v):
        return max(row_mult, (v // 2) // row_mult * row_mult)

    for _ in range(64):
        if need(bb, bk, bn) <= budget:
            break
        if not fixed_n and bn > 512:
            bn = half_128(bn)
        elif not fixed_k and bk > 256:
            bk = half_128(bk)
        elif not fixed_b and bb > 2 * row_mult:
            bb = half_row(bb)
        elif not fixed_n and bn > 128:
            bn = half_128(bn)
        elif not fixed_k and bk > 128:
            bk = half_128(bk)
        else:
            # TODO(synk): for huge d1 (>= 4096) add a d1-chunked inner
            # pipeline (pltpu.emit_pipeline) instead of giving up here.
            break

    vmem_limit = int(min(max(need(bb, bk, bn) + (8 << 20), 32 << 20),
                         int(0.90 * cap)))
    return bb, bk, bn, d1p, vmem_limit, row_mult


class MlpParams(NamedTuple):
    """Pre-padded / pre-cast weights (hoists HBM pad+cast out of every call)."""
    w1: jax.Array   # (d1p, d2p) in compute dtype
    b1: jax.Array   # (1, d2p) f32
    w2: jax.Array   # (d2p, d3p) in compute dtype
    b2: jax.Array   # (1, d3p) f32
    d1: int
    d2: int
    d3: int
    block_k: int
    block_n: int


def prepare_mlp_params(w1, b1, w2, b2, *, compute_dtype=None,
                       block_k=None, block_n=None):
    """Pad d1->128, d2->block_k, d3->block_n multiples and cast once.

    compute_dtype: MXU input dtype.  Recommended jnp.bfloat16 on v6e/v7x
    (f32 accumulation and f32 epilogue are kept inside the kernel).
    """
    d1, d2 = w1.shape
    d3 = w2.shape[1]
    cdt = jnp.dtype(compute_dtype) if compute_dtype is not None else jnp.dtype(w1.dtype)

    _, bk, bn, d1p, _, _ = _plan_tiles(d1, d2, d3, cdt, jnp.float32,
                                       block_k=block_k, block_n=block_n)
    d2p = _round_up(d2, bk)
    d3p = _round_up(d3, bn)

    w1p = w1.astype(cdt)
    w2p = w2.astype(cdt)
    b1p = b1.astype(jnp.float32)
    b2p = b2.astype(jnp.float32)
    if (d1p, d2p) != tuple(w1p.shape):
        w1p = jnp.pad(w1p, ((0, d1p - d1), (0, d2p - d2)))
    if (d2p, d3p) != tuple(w2p.shape):
        w2p = jnp.pad(w2p, ((0, d2p - d2), (0, d3p - d3)))
    if d2p != d2:
        b1p = jnp.pad(b1p, (0, d2p - d2))
    if d3p != d3:
        b2p = jnp.pad(b2p, (0, d3p - d3))
    return MlpParams(w1p, b1p.reshape(1, d2p), w2p, b2p.reshape(1, d3p),
                     int(d1), int(d2), int(d3), int(bk), int(bn))


# --------------------------- kernels ---------------------------------------

def _mlp_kernel_acc(x_ref, w1_ref, b1_ref, w2_ref, b2_ref, o_ref, acc_ref):
    """(i, n, k) step of relu(x@w1+b1) @ w2 + b2 with d2 accumulation."""
    k = pl.program_id(2)

    @pl.when(k == 0)
    def _():
        # Fold the fc2 bias into the accumulator init (saves a VPU pass).
        acc_ref[...] = jnp.broadcast_to(b2_ref[...], acc_ref.shape)

    # fc1 tile on the MXU, f32 accumulation; bias + ReLU on the VPU in f32.
    h = jnp.dot(x_ref[...], w1_ref[...], preferred_element_type=jnp.float32)
    h = jnp.maximum(h + b1_ref[...], 0.0)
    # dropout == identity (eval mode)

    acc_ref[...] += jnp.dot(h.astype(w2_ref.dtype), w2_ref[...],
                            preferred_element_type=jnp.float32)

    @pl.when(k == pl.num_programs(2) - 1)
    def _():
        o_ref[...] = acc_ref[...].astype(o_ref.dtype)


def _mlp_kernel_single(x_ref, w1_ref, b1_ref, w2_ref, b2_ref, o_ref):
    """Single-k-step variant: no accumulator scratch, write out directly."""
    h = jnp.dot(x_ref[...], w1_ref[...], preferred_element_type=jnp.float32)
    h = jnp.maximum(h + b1_ref[...], 0.0)
    o = jnp.dot(h.astype(w2_ref.dtype), w2_ref[...],
                preferred_element_type=jnp.float32)
    o_ref[...] = (o + b2_ref[...]).astype(o_ref.dtype)


# --------------------------- wrapper ----------------------------------------

def mlp_forward(x, w1, b1=None, w2=None, b2=None, *, block_b=None,
                block_k=None, block_n=None, compute_dtype=None,
                w2_buffers=2, out_dtype=None):
    """Fused MLP forward: relu(x @ w1 + b1) @ w2 + b2 (dropout = eval identity).

    Either call with raw (w1, b1, w2, b2) or pass an MlpParams from
    prepare_mlp_params() as the second argument (preferred: padding / casting
    is then done once, not per forward).  block_k / block_n are taken from
    the prepared params when given.
    """
    if isinstance(w1, MlpParams):
        params = w1
    else:
        params = prepare_mlp_params(w1, b1, w2, b2, compute_dtype=compute_dtype,
                                    block_k=block_k, block_n=block_n)

    d1, d2, d3 = params.d1, params.d2, params.d3
    bk, bn = params.block_k, params.block_n
    cdt = jnp.dtype(params.w1.dtype)
    d1p, d2p = params.w1.shape
    d3p = params.w2.shape[1]

    B = x.shape[0]
    out_dt = jnp.dtype(out_dtype) if out_dtype is not None else jnp.dtype(x.dtype)

    bb, _, _, _, vmem_limit, row_mult = _plan_tiles(
        d1, d2, d3, cdt, out_dt, block_b=block_b, block_k=bk, block_n=bn,
        w2_buffers=w2_buffers)
    if B <= bb:
        bb = B                      # full-array batch block for small batches

    # x is cast / d1-padded per call (cheap relative to the weight traffic).
    x = x.astype(cdt)
    if d1p != d1:
        x = jnp.pad(x, ((0, 0), (0, d1p - d1)))

    ni = pl.cdiv(B, bb)
    nn = d3p // bn
    nk = d2p // bk
    itm = cdt.itemsize
    out_itm = out_dt.itemsize

    cost = pl.CostEstimate(
        flops=2 * B * d1p * d2p + 2 * B * d2p * d3p,
        transcendentals=0,
        bytes_accessed=int(
            ni * bb * d1p * itm            # x, once per batch tile
            + ni * nn * d1p * d2p * itm    # w1, re-streamed per (i, n)
            + ni * d2p * d3p * itm         # w2, re-streamed per batch tile
            + ni * nn * d2p * 4            # b1
            + ni * d3p * 4                 # b2
            + B * d3p * out_itm),          # output writeback
    )

    def _w2_spec(shape, index_map):
        if w2_buffers != 2:
            # v5e option: third buffer hides the long w2 DMA (don't use on v7x).
            return pl.BlockSpec(shape, index_map,
                                pipeline_mode=pl.Buffered(w2_buffers))
        return pl.BlockSpec(shape, index_map)

    if nk == 1:
        grid = (ni, nn)
        in_specs = [
            pl.BlockSpec((bb, d1p), lambda i, n: (i, 0)),
            pl.BlockSpec((d1p, d2p), lambda i, n: (0, 0)),
            pl.BlockSpec((1, d2p), lambda i, n: (0, 0)),
            _w2_spec((d2p, bn), lambda i, n: (0, n)),
            pl.BlockSpec((1, bn), lambda i, n: (0, n)),
        ]
        out_specs = pl.BlockSpec((bb, bn), lambda i, n: (i, n))
        scratch = []
        kernel = _mlp_kernel_single
        semantics = ("parallel", "parallel")
    else:
        grid = (ni, nn, nk)
        in_specs = [
            pl.BlockSpec((bb, d1p), lambda i, n, k: (i, 0)),
            pl.BlockSpec((d1p, bk), lambda i, n, k: (0, k)),
            pl.BlockSpec((1, bk), lambda i, n, k: (0, k)),
            _w2_spec((bk, bn), lambda i, n, k: (k, n)),
            pl.BlockSpec((1, bn), lambda i, n, k: (0, n)),
        ]
        out_specs = pl.BlockSpec((bb, bn), lambda i, n, k: (i, n))
        scratch = [pltpu.VMEM((bb, bn), jnp.float32)]
        kernel = _mlp_kernel_acc
        semantics = ("parallel", "parallel", "arbitrary")

    out = pl.pallas_call(
        kernel,
        out_shape=jax.ShapeDtypeStruct((B, d3p), out_dt),
        grid_spec=pltpu.PrefetchScalarGridSpec(
            num_scalar_prefetch=0,
            grid=grid,
            in_specs=in_specs,
            out_specs=out_specs,
            scratch_shapes=scratch,
        ),
        compiler_params=pltpu.CompilerParams(
            dimension_semantics=semantics,
            vmem_limit_bytes=int(vmem_limit),
        ),
        cost_estimate=cost,
    )(x, params.w1, params.b1, params.w2, params.b2)

    return out[:, :d3] if d3p != d3 else out


def init_mlp_params(key, d1, d2, d3, dtype=jnp.float32):
    """nn.Linear-style init; weights stored as (in, out) for the kernel."""
    k1, k2, k3, k4 = jax.random.split(key, 4)
    lim1 = 1.0 / (d1 ** 0.5)
    lim2 = 1.0 / (d2 ** 0.5)
    w1 = jax.random.uniform(k1, (d1, d2), dtype, minval=-lim1, maxval=lim1)
    b1 = jax.random.uniform(k2, (d2,), dtype, minval=-lim1, maxval=lim1)
    w2 = jax.random.uniform(k3, (d2, d3), dtype, minval=-lim2, maxval=lim2)
    b2 = jax.random.uniform(k4, (d3,), dtype, minval=-lim2, maxval=lim2)
    return w1, b1, w2, b2


if __name__ == "__main__":
    # --- tiny demo shapes (module defaults), prepare-once path -----------
    d1, d2, d3 = 32, 64, 32
    batch = 8
    key = jax.random.PRNGKey(0)
    kx, kp = jax.random.split(key)
    x = jax.random.normal(kx, (batch, d1), jnp.float32)
    w1, b1, w2, b2 = init_mlp_params(kp, d1, d2, d3)

    params = prepare_mlp_params(w1, b1, w2, b2)        # pad/cast hoisted once
    out = jax.block_until_ready(mlp_forward(x, params))
    ref = jnp.maximum(x @ w1 + b1, 0.0) @ w2 + b2
    assert out.shape == (batch, d3)
    assert jnp.allclose(out, ref, atol=1e-4, rtol=1e-4)

    # --- exercise the 3-D tiled (batch x d3 x d2-reduction) path ---------
    d1b, d2b, d3b = 64, 256, 384
    Bb = 40                                   # not a multiple of the tile
    kx2, kp2 = jax.random.split(jax.random.PRNGKey(1))
    x2 = jax.random.normal(kx2, (Bb, d1b), jnp.float32)
    p2 = init_mlp_params(kp2, d1b, d2b, d3b)
    params2 = prepare_mlp_params(*p2, block_k=128, block_n=128)
    out2 = jax.block_until_ready(mlp_forward(x2, params2, block_b=16))
    ref2 = jnp.maximum(x2 @ p2[0] + p2[1], 0.0) @ p2[2] + p2[3]
    assert out2.shape == (Bb, d3b)
    assert jnp.allclose(out2, ref2, atol=1e-4, rtol=1e-4)

    # --- bf16 MXU path (recommended on v6e/v7x), f32 accumulation --------
    params3 = prepare_mlp_params(*p2, compute_dtype=jnp.bfloat16,
                                 block_k=128, block_n=128)
    out3 = jax.block_until_ready(mlp_forward(x2, params3, block_b=16))
    assert out3.shape == (Bb, d3b)
    assert jnp.allclose(out3, ref2, atol=5e-2, rtol=5e-2)

    # --- raw-weight call path (lazy pad/cast inside, same semantics) -----
    out4 = jax.block_until_ready(mlp_forward(x, w1, b1, w2, b2))
    assert jnp.allclose(out4, ref, atol=1e-4, rtol=1e-4)

    print("KERNEL_OK")
</pallas_src>

<mosaic_0001>
module attributes {stable_mosaic.version = 11 : i64} {
  func.func @_mlp_kernel_single(%arg0: i32, %arg1: i32, %arg2: memref<8x128xf32, #tpu.memory_space<vmem>>, %arg3: memref<128x128xf32, #tpu.memory_space<vmem>>, %arg4: memref<1x128xf32, #tpu.memory_space<vmem>>, %arg5: memref<128x128xf32, #tpu.memory_space<vmem>>, %arg6: memref<1x128xf32, #tpu.memory_space<vmem>>, %arg7: memref<8x128xf32, #tpu.memory_space<vmem>>) attributes {dimension_semantics = [#tpu.dimension_semantics<parallel>, #tpu.dimension_semantics<parallel>], iteration_bounds = array<i64: 1, 1>, scalar_prefetch = 0 : i64, scratch_operands = 0 : i64, tpu.core_type = #tpu.core_type<tc>, window_params = [{transform_indices = @transform_0, window_bounds = array<i64: 8, 128>}, {pipeline_mode = #tpu.pipeline_mode<synchronous>, transform_indices = @transform_1, window_bounds = array<i64: 128, 128>}, {pipeline_mode = #tpu.pipeline_mode<synchronous>, transform_indices = @transform_2, window_bounds = array<i64: 1, 128>}, {transform_indices = @transform_3, window_bounds = array<i64: 128, 128>}, {transform_indices = @transform_4, window_bounds = array<i64: 1, 128>}, {transform_indices = @transform_5, window_bounds = array<i64: 8, 128>}]} {
    %c0 = arith.constant 0 : index
    %c0_0 = arith.constant 0 : index
    %0 = vector.load %arg2[%c0, %c0_0] : memref<8x128xf32, #tpu.memory_space<vmem>>, vector<8x128xf32>
    %c0_1 = arith.constant 0 : index
    %c0_2 = arith.constant 0 : index
    %1 = vector.load %arg3[%c0_1, %c0_2] : memref<128x128xf32, #tpu.memory_space<vmem>>, vector<128x128xf32>
    %cst = arith.constant dense<0.000000e+00> : vector<8x128xf32>
    %2 = tpu.matmul %0, %1, %cst {dimension_numbers = #tpu.dot_dimension_numbers<[1], [0], [0], [1], [0, 0, 1, 1], [], []>} : vector<8x128xf32>, vector<128x128xf32>, vector<8x128xf32> -> vector<8x128xf32>
    %c0_3 = arith.constant 0 : index
    %c0_4 = arith.constant 0 : index
    %3 = vector.load %arg4[%c0_3, %c0_4] : memref<1x128xf32, #tpu.memory_space<vmem>>, vector<1x128xf32>
    %4 = vector.broadcast %3 : vector<1x128xf32> to vector<8x128xf32>
    %5 = arith.addf %2, %4 : vector<8x128xf32>
    %cst_5 = arith.constant 0.000000e+00 : f32
    %6 = vector.broadcast %cst_5 : f32 to vector<8x128xf32>
    %7 = arith.maximumf %5, %6 : vector<8x128xf32>
    %c0_6 = arith.constant 0 : index
    %c0_7 = arith.constant 0 : index
    %8 = vector.load %arg5[%c0_6, %c0_7] : memref<128x128xf32, #tpu.memory_space<vmem>>, vector<128x128xf32>
    %cst_8 = arith.constant dense<0.000000e+00> : vector<8x128xf32>
    %9 = tpu.matmul %7, %8, %cst_8 {dimension_numbers = #tpu.dot_dimension_numbers<[1], [0], [0], [1], [0, 0, 1, 1], [], []>} : vector<8x128xf32>, vector<128x128xf32>, vector<8x128xf32> -> vector<8x128xf32>
    %c0_9 = arith.constant 0 : index
    %c0_10 = arith.constant 0 : index
    %10 = vector.load %arg6[%c0_9, %c0_10] : memref<1x128xf32, #tpu.memory_space<vmem>>, vector<1x128xf32>
    %11 = vector.broadcast %10 : vector<1x128xf32> to vector<8x128xf32>
    %12 = arith.addf %9, %11 : vector<8x128xf32>
    %c0_11 = arith.constant 0 : index
    %c0_12 = arith.constant 0 : index
    %13 = vector.load %arg7[%c0_11, %c0_12] : memref<8x128xf32, #tpu.memory_space<vmem>>, vector<8x128xf32>
    tpu.vector_store %arg7[%c0_11, %c0_12], %12 {strides = array<i32>} : memref<8x128xf32, #tpu.memory_space<vmem>>, vector<8x128xf32>,
    return
  }
  func.func @transform_0(%arg0: i32, %arg1: i32) -> (i32, i32) {
    %c0_i32 = arith.constant 0 : i32
    %c0_i32_0 = arith.constant 0 : i32
    return %arg0, %c0_i32 : i32, i32
  }
  func.func @transform_1(%arg0: i32, %arg1: i32) -> (i32, i32) {
    %c0_i32 = arith.constant 0 : i32
    %c0_i32_0 = arith.constant 0 : i32
    %c0_i32_1 = arith.constant 0 : i32
    return %c0_i32, %c0_i32_0 : i32, i32
  }
  func.func @transform_2(%arg0: i32, %arg1: i32) -> (i32, i32) {
    %c0_i32 = arith.constant 0 : i32
    %c0_i32_0 = arith.constant 0 : i32
    %c0_i32_1 = arith.constant 0 : i32
    return %c0_i32, %c0_i32_0 : i32, i32
  }
  func.func @transform_3(%arg0: i32, %arg1: i32) -> (i32, i32) {
    %c0_i32 = arith.constant 0 : i32
    %c0_i32_0 = arith.constant 0 : i32
    return %c0_i32, %arg1 : i32, i32
  }
  func.func @transform_4(%arg0: i32, %arg1: i32) -> (i32, i32) {
    %c0_i32 = arith.constant 0 : i32
    %c0_i32_0 = arith.constant 0 : i32
    return %c0_i32, %arg1 : i32, i32
  }
  func.func @transform_5(%arg0: i32, %arg1: i32) -> (i32, i32) {
    %c0_i32 = arith.constant 0 : i32
    return %arg0, %arg1 : i32, i32
  }
}

</mosaic_0001>

<bundles_post_ra>
// kernel: tpu_custom_call.1
= control target key start
LH: loop header
LB: loop body
LE: loop exit
PB: predicated region body
PF: predicated region fallthrough
CT: control target
= control target key end

     0   :  { %10 = vsyncpa [#allocation3], 0  ;;  %s637_s0 = inlined_call_operand.hbm [shape: f32[8,128], index: 0, kind: input, shape index: {}]   ;;  %s638_s1 = inlined_call_operand.hbm [shape: f32[128,128], index: 1, kind: input, shape index: {}]   ;;  %s639_s2 = inlined_call_operand.vmem [shape: f32[1,128], index: 2, kind: input, shape index: {}]   ;;  %s640_s3 = inlined_call_operand.hbm [shape: f32[128,128], index: 3, kind: input, shape index: {}]   ;;  %s641_s4 = inlined_call_operand.vmem [shape: f32[1,128], index: 4, kind: input, shape index: {}]   ;;  %s642_s5 = inlined_call_operand.hbm [shape: f32[8,128], index: 5, kind: output, shape index: {}]  }
   0x1   :  { %11 = vsyncpa [#allocation6], 0 }
   0x2   :  { %12 = vsyncpa [#allocation4], 0  ;;  %s522_s18 = smov [#allocation5]   ;;  %s428_s22 = scalar_lea.hbm %s638_s1, 2048 }
   0x3   :  { %s28_s19 = sshll.u32 %s522_s18, 4  ;;  %p429_p0 = scmp.ne.s32.totalorder %s638_s1, %s428_s22  ;;  %s29_s19 = int_to_ptr.vmem [resolvable:$true] %s28_s19 }
   0x4   :  { %p432_p1 = scmp.lt.u32.totalorder %s428_s22, %s638_s1 }
   0x6   :  { %p434_p2 = pnand %p432_p1, %p429_p0 }
   0x8   :  { %437 = shalt.err (!%p434_p2)
}
   0x9   :  { %s438_s27 = scalar_lea.vmem %s29_s19, 2048  ;;  %p443_p4 = scmp.lt.s32.totalorder %s29_s19, %s29_s19 }
   0xa   :  { %p439_p3 = scmp.ne.s32.totalorder %s29_s19, %s438_s27  ;;  %p444_p5 = scmp.lt.s32.totalorder %s438_s27, %s438_s27 }
   0xc   :  { %p445_p6 = por %p444_p5, %p443_p4 }
   0xe   :  { %p446_p7 = pnand %p445_p6, %p439_p3 }
  0x10   :  { %449 = shalt.err (!%p446_p7)
}
  0x11   :  { %s523_s28 = smov 128   ;;  %s524_s29 = smov 8  }
  0x12   :  { %34 = dma.hbm_to_vmem [thread:$0]  %s638_s1, 2048, %s29_s19, [#allocation6], %s523_s28, %s523_s28, %s524_s29  }
  0x13   :  { %s525_s7 = smov [#allocation2]   ;;  %s526_s9 = smov [#allocation7]  }
  0x14   :  { %s19_s8 = sshll.u32 %s525_s7, 4  ;;  %s42_s10 = sshll.u32 %s526_s9, 4  ;;  %s20_s8 = int_to_ptr.vmem [resolvable:$true] %s19_s8  ;;  %s43_s10 = int_to_ptr.vmem [resolvable:$true] %s42_s10 }
  0x15   :  { %s450_s13 = scalar_lea.hbm %s637_s0, 128 }
  0x16   :  { %p451_p8 = scmp.ne.s32.totalorder %s637_s0, %s450_s13  ;;  %p454_p9 = scmp.lt.u32.totalorder %s450_s13, %s637_s0 }
  0x18   :  { %p456_p10 = pnand %p454_p9, %p451_p8 }
  0x1a   :  { %459 = shalt.err (!%p456_p10)
}
  0x1b   :  { %s460_s1 = scalar_lea.vmem %s20_s8, 128  ;;  %p465_p12 = scmp.lt.s32.totalorder %s20_s8, %s20_s8 }
  0x1c   :  { %p461_p11 = scmp.ne.s32.totalorder %s20_s8, %s460_s1  ;;  %p466_p13 = scmp.lt.s32.totalorder %s460_s1, %s460_s1 }
  0x1e   :  { %p467_p0 = por %p466_p13, %p465_p12 }
  0x20   :  { %p468_p1 = pnand %p467_p0, %p461_p11 }
  0x22   :  { %471 = shalt.err (!%p468_p1)
}
  0x23   :  { %22 = dma.hbm_to_vmem [thread:$0]  %s637_s0, 128, %s20_s8, [#allocation3]  }
  0x24   :  { %s472_s22 = scalar_lea.hbm %s640_s3, 2048 }
  0x25   :  { %p473_p2 = scmp.ne.s32.totalorder %s640_s3, %s472_s22  ;;  %p476_p3 = scmp.lt.u32.totalorder %s472_s22, %s640_s3 }
  0x27   :  { %p478_p4 = pnand %p476_p3, %p473_p2 }
  0x29   :  { %481 = shalt.err (!%p478_p4)
}
  0x2a   :  { %s482_s27 = scalar_lea.vmem %s43_s10, 2048  ;;  %p487_p6 = scmp.lt.s32.totalorder %s43_s10, %s43_s10 }
  0x2b   :  { %p483_p5 = scmp.ne.s32.totalorder %s43_s10, %s482_s27  ;;  %p488_p7 = scmp.lt.s32.totalorder %s482_s27, %s482_s27 }
  0x2d   :  { %p489_p8 = por %p488_p7, %p487_p6 }
  0x2f   :  { %p490_p9 = pnand %p489_p8, %p483_p5 }
  0x31   :  { %493 = shalt.err (!%p490_p9)
}
  0x32   :  { %48 = dma.hbm_to_vmem [thread:$0]  %s640_s3, 2048, %s43_s10, [#allocation6], %s523_s28, %s523_s28, %s524_s29  }
  0x33   :  { %516 = dma.done.wait [#allocation3], 128  }
  0x34   :  { %517 = vsyncadd [#allocation3], 4294967168 }
  0x35   :  { %518 = dma.done.wait [#allocation6], 4096  }
  0x36   :  { %519 = vsyncadd [#allocation6], 4294963200  ;;  %v527_v0 = vmov 0.0|0.0   ;;  %vm528_vm0 = vmmov 0   ;;  %v529_v1 = vmov 0.0   ;;  %v61_v2 = vld [vmem:[#allocation5] sm:$0xff] }
  0x37   :  { %371 = vmatprep.subr.bf16.mxu0 %v527_v0  ;;  %333 = vmatprep.mubr.msk.f32.mxu0 %vm528_vm0, %v529_v1  ;;  %v62_v3 = vld [vmem:[#allocation5 + $0x8] sm:$0xff]  ;;  %v63_v4 = vld [vmem:[#allocation5 + $0x10] sm:$0xff]  ;;  %v64_v6 = vld [vmem:[#allocation5 + $0x18] sm:$0xff]  ;;  %s530_s7 = smov [#allocation8]  }
  0x38   :  { %395 = vmatprep.subr.bf16.mxu1 %v527_v0  ;;  %368 = vmatprep.mubr.msk.f32.mxu1 %vm528_vm0, %v529_v1  ;;  %v372_v5 = vpack.c.bf16 %v62_v3, %v61_v2  ;;  %v375_v7 = vpack.c.bf16 %v64_v6, %v63_v4  ;;  %v65_v8 = vld [vmem:[#allocation5 + $0x20] sm:$0xff]  ;;  %v66_v9 = vld [vmem:[#allocation5 + $0x28] sm:$0xff]  ;;  %v157_v12 = vld [vmem:[#allocation7 + $0x10] sm:$0xff]  ;;  %s255_s8 = sshll.u32 %s530_s7, 4  ;;  %s256_s8 = int_to_ptr.vmem [resolvable:$true] %s255_s8 }
  0x39   :  { %v155_v10 = vld [vmem:[#allocation7] sm:$0xff]  ;;  %v156_v11 = vld [vmem:[#allocation7 + $0x8] sm:$0xff]  ;;  %v158_v13 = vld [vmem:[#allocation7 + $0x18] sm:$0xff]  ;;  %v378_v14 = vpack.c.bf16 %v66_v9, %v65_v8  ;;  %s494_s9 = scalar_lea.vmem %s256_s8, 128  ;;  %p499_p11 = scmp.lt.s32.totalorder %s256_s8, %s256_s8 }
  0x3a   :  { %373 = vmatpush3.bf16.msra.mxu0 %v372_v5  ;;  %v396_v15 = vpack.c.bf16 %v156_v11, %v155_v10  ;;  %v67_v16 = vld [vmem:[#allocation5 + $0x30] sm:$0xff]  ;;  %v68_v17 = vld [vmem:[#allocation5 + $0x38] sm:$0xff]  ;;  %v399_v18 = vpack.c.bf16 %v158_v13, %v157_v12  ;;  %v159_v19 = vld [vmem:[#allocation7 + $0x20] sm:$0xff]  ;;  %p495_p10 = scmp.ne.s32.totalorder %s256_s8, %s494_s9  ;;  %p500_p12 = scmp.lt.s32.totalorder %s494_s9, %s494_s9 }
  0x3b   :  { %374 = vmatprep.subr.bf16.mxu0 %v527_v0  ;;  %v160_v20 = vld [vmem:[#allocation7 + $0x28] sm:$0xff]  ;;  %v381_v21 = vpack.c.bf16 %v68_v17, %v67_v16  ;;  %v69_v22 = vld [vmem:[#allocation5 + $0x40] sm:$0xff]  ;;  %v161_v25 = vld [vmem:[#allocation7 + $0x30] sm:$0xff] }
  0x3c   :  { %397 = vmatpush3.bf16.msra.mxu1 %v396_v15  ;;  %v70_v23 = vld [vmem:[#allocation5 + $0x48] sm:$0xff]  ;;  %v402_v24 = vpack.c.bf16 %v160_v20, %v159_v19  ;;  %v162_v26 = vld [vmem:[#allocation7 + $0x38] sm:$0xff]  ;;  %v71_v28 = vld [vmem:[#allocation5 + $0x50] sm:$0xff]  ;;  %p501_p13 = por %p500_p12, %p499_p11 }
  0x3d   :  { %398 = vmatprep.subr.bf16.mxu1 %v527_v0  ;;  %v384_v27 = vpack.c.bf16 %v70_v23, %v69_v22  ;;  %v72_v29 = vld [vmem:[#allocation5 + $0x58] sm:$0xff]  ;;  %v405_v30 = vpack.c.bf16 %v162_v26, %v161_v25  ;;  %v163_v31 = vld [vmem:[#allocation7 + $0x40] sm:$0xff]  ;;  %v164_v32 = vld [vmem:[#allocation7 + $0x48] sm:$0xff] }
  0x3e   :  { %376 = vmatpush3.bf16.msra.mxu0 %v375_v7  ;;  %v387_v33 = vpack.c.bf16 %v72_v29, %v71_v28  ;;  %v73_v34 = vld [vmem:[#allocation5 + $0x60] sm:$0xff]  ;;  %v74_v35 = vld [vmem:[#allocation5 + $0x68] sm:$0xff]  ;;  %v408_v36 = vpack.c.bf16 %v164_v32, %v163_v31  ;;  %v165_v37 = vld [vmem:[#allocation7 + $0x50] sm:$0xff]  ;;  %p502_p0 = pnand %p501_p13, %p495_p10 }
  0x3f   :  { %377 = vmatprep.subr.bf16.mxu0 %v527_v0  ;;  %v166_v38 = vld [vmem:[#allocation7 + $0x58] sm:$0xff]  ;;  %v390_v39 = vpack.c.bf16 %v74_v35, %v73_v34  ;;  %v75_v40 = vld [vmem:[#allocation5 + $0x70] sm:$0xff]  ;;  %v167_v43 = vld [vmem:[#allocation7 + $0x60] sm:$0xff] }
  0x40   :  { %400 = vmatpush3.bf16.msra.mxu1 %v399_v18  ;;  %v76_v41 = vld [vmem:[#allocation5 + $0x78] sm:$0xff]  ;;  %v411_v42 = vpack.c.bf16 %v166_v38, %v165_v37  ;;  %v168_v44 = vld [vmem:[#allocation7 + $0x68] sm:$0xff]  ;;  %v169_v48 = vld [vmem:[#allocation7 + $0x70] sm:$0xff] }
  0x41   :  { %401 = vmatprep.subr.bf16.mxu1 %v527_v0  ;;  %v393_v45 = vpack.c.bf16 %v76_v41, %v75_v40  ;;  %v414_v46 = vpack.c.bf16 %v168_v44, %v167_v43  ;;  %v60_v47 = vld [vmem:[#allocation2] sm:$0xff] }
  0x42   :  { %379 = vmatpush3.bf16.msra.mxu0 %v378_v14  ;;  %v170_v49 = vld [vmem:[#allocation7 + $0x78] sm:$0xff] }
  0x43   :  { %380 = vmatprep.subr.bf16.mxu0 %v527_v0  ;;  %v417_v50 = vpack.c.bf16 %v170_v49, %v169_v48  ;;  %v265_v51 = vld [vmem:[%s639_s2] ss:$0 sm:$0xff] }
  0x44   :  { %403 = vmatpush3.bf16.msra.mxu1 %v402_v24  ;;  %v266_v56 = vld [vmem:[%s641_s4] ss:$0 sm:$0xff] }
  0x45   :  { %404 = vmatprep.subr.bf16.mxu1 %v527_v0 }
  0x46   :  { %382 = vmatpush3.bf16.msra.mxu0 %v381_v21 }
  0x47   :  { %383 = vmatprep.subr.bf16.mxu0 %v527_v0 }
  0x48   :  { %406 = vmatpush3.bf16.msra.mxu1 %v405_v30 }
  0x49   :  { %407 = vmatprep.subr.bf16.mxu1 %v527_v0 }
  0x4a   :  { %385 = vmatpush3.bf16.msra.mxu0 %v384_v27 }
  0x4b   :  { %386 = vmatprep.subr.bf16.mxu0 %v527_v0 }
  0x4c   :  { %409 = vmatpush3.bf16.msra.mxu1 %v408_v36 }
  0x4d   :  { %410 = vmatprep.subr.bf16.mxu1 %v527_v0 }
  0x4e   :  { %388 = vmatpush3.bf16.msra.mxu0 %v387_v33 }
  0x4f   :  { %389 = vmatprep.subr.bf16.mxu0 %v527_v0 }
  0x50   :  { %412 = vmatpush3.bf16.msra.mxu1 %v411_v42 }
  0x51   :  { %413 = vmatprep.subr.bf16.mxu1 %v527_v0 }
  0x52   :  { %391 = vmatpush3.bf16.msra.mxu0 %v390_v39 }
  0x53   :  { %392 = vmatprep.subr.bf16.mxu0 %v527_v0 }
  0x54   :  { %415 = vmatpush3.bf16.msra.mxu1 %v414_v46 }
  0x55   :  { %416 = vmatprep.subr.bf16.mxu1 %v527_v0 }
  0x56   :  { %394 = vmatpush3.bf16.msra.mxu0 %v393_v45 }
  0x58   :  { %418 = vmatpush3.bf16.msra.mxu1 %v417_v50 }
  0x59   :  { %334 = vmatmul.mubr.f32.vlgmr.msra.gmra.mrb[0].mxu0 %v60_v47 }
 0x12c   :  { %v150_v52 = vpop.f32.mrb[0].mxu0 }
 0x12d   :  { %v151_v53 = vadd.f32 %v265_v51, %v150_v52  ;;  %v335_v54 = vpop.f32.mrb[1].mxu0 }
 0x12f   :  { %v154_v55 = vmax.f32 %v151_v53, 0.0 }
 0x131   :  { %369 = vmatmul.mubr.f32.vlgmr.msra.gmra.mrb[0].mxu1 %v154_v55 }
 0x204   :  { %v244_v57 = vpop.f32.mrb[0].mxu1 }
 0x205   :  { %v245_v58 = vadd.f32 %v266_v56, %v244_v57  ;;  %v370_v59 = vpop.f32.mrb[1].mxu1 }
 0x207   :  { %248 = vst [vmem:[#allocation8] sm:$0xff] %v245_v58 }
 0x208   :  { %505 = shalt.err (!%p502_p0)
}
 0x209   :  { %s506_s11 = scalar_lea.hbm %s642_s5, 128 }
 0x20a   :  { %p507_p1 = scmp.ne.s32.totalorder %s642_s5, %s506_s11  ;;  %p510_p2 = scmp.lt.u32.totalorder %s506_s11, %s642_s5 }
 0x20c   :  { %p512_p3 = pnand %p510_p2, %p507_p1 }
 0x20e   :  { %515 = shalt.err (!%p512_p3)
}
 0x20f   :  { %258 = dma.vmem_to_hbm [thread:$0]  %s256_s8, 128, %s642_s5, [#allocation4]  }
 0x210   :  { %520 = dma.done.wait [#allocation4], 128  }
 0x211   :  { %521 = vsyncadd [#allocation4], 4294967168 }
 0x212   :  { %262 = vsyncpa [#allocation3], 1 }
 0x213   :  { %263 = vsyncpa [#allocation6], 1 }
 0x214   :  { %264 = vsyncpa [#allocation4], 1 }

</bundles_post_ra>
